<compile_context>
chip_gen: v7x
topology: tpu7x:2x2x1
jax: 0.10.0
libtpu: 0.0.40
codegen_flags: <defaults>
</compile_context>

<pallas_src>
import functools

import jax
import jax.numpy as jnp
from jax.experimental import pallas as pl
from jax.experimental.pallas import tpu as pltpu


# ---------------------------------------------------------------------------
# Fused kernel. Grid axis 0 iterates the reduction over the padded feature dim.
# ---------------------------------------------------------------------------
def _fused_proto_kernel(x_ref, w_ref, lab_ref, b_ref, out_ref, acc_ref, *,
                        ns_pad, tk):
    k = pl.program_id(0)

    @pl.when(k == 0)
    def _init():
        acc_ref[...] = jnp.zeros_like(acc_ref)

    # x stays resident; slice the K chunk in-kernel (aligned, multiple of 128).
    kofs = pl.multiple_of(k * tk, 128)
    x_blk = x_ref[:, pl.ds(kofs, tk)]                       # (N_pad, tk) bf16

    # bf16 x bf16 -> f32 accumulate on the MXU.
    acc_ref[...] += jnp.dot(x_blk, w_ref[...],
                            preferred_element_type=jnp.float32)

    @pl.when(k == pl.num_programs(0) - 1)
    def _epilogue():
        # Backbone epilogue (bias folded into the final K step, all f32).
        z = acc_ref[...] + b_ref[...]                       # (N_pad, Dp)
        zs = z[:ns_pad, :]                                  # support embeddings
        zq = z[ns_pad:, :]                                  # query embeddings

        labels = lab_ref[...]                               # (ns_pad, n_way) one-hot f32

        # Per-class prototypes, built transposed: (Dp, n_way).
        counts = jnp.sum(labels, axis=0, keepdims=True)                 # (1, n_way)
        inv_counts = 1.0 / jnp.maximum(counts, 1.0)                     # exact
        protoT = jax.lax.dot_general(
            zs, labels, (((0,), (0,)), ((), ())),
            preferred_element_type=jnp.float32)                          # (Dp, n_way)
        protoT = protoT * inv_counts

        # Pairwise Euclidean distance (torch.cdist): ||q||^2 + ||p||^2 - 2 q.p
        cross = jnp.dot(zq, protoT, preferred_element_type=jnp.float32)  # (nq, n_way)
        q2 = jnp.sum(zq * zq, axis=1, keepdims=True)                     # (nq, 1)
        p2 = jnp.sum(protoT * protoT, axis=0, keepdims=True)             # (1, n_way)
        d2 = jnp.maximum(q2 + p2 - 2.0 * cross, 0.0)
        scores = -jnp.sqrt(d2)

        # softmax over classes (dim 1); exact denominator.
        m = jnp.max(scores, axis=1, keepdims=True)
        e = jnp.exp(scores - m)
        denom = jnp.sum(e, axis=1, keepdims=True)
        out_ref[...] = e / denom


def _pad_axis(x, axis, multiple):
    pad = (-x.shape[axis]) % multiple
    if pad == 0:
        return x
    widths = [(0, 0)] * x.ndim
    widths[axis] = (0, pad)
    return jnp.pad(x, widths)


# ---------------------------------------------------------------------------
# One-time parameter preparation (hoisted out of the per-call path).
# ---------------------------------------------------------------------------
def prepare_backbone_params(w, b, *, tk_max=2048):
    """Pads W to (F_pad, D_pad), casts to bf16, pads bias to (1, D_pad) f32.

    Done ONCE (cache the results); the per-call forward only streams the
    prepared bf16 W.  Returns (w_prep, b_prep, tk).
    """
    f_dim = w.shape[0]
    f_pad128 = 128 * pl.cdiv(f_dim, 128)
    tk = max(128, (min(tk_max, f_pad128) // 128) * 128)

    w_p = _pad_axis(_pad_axis(w.astype(jnp.float32), 0, tk), 1, 128)
    w_prep = w_p.astype(jnp.bfloat16)                       # (F_pad, D_pad) bf16
    b_prep = _pad_axis(b.reshape(1, -1).astype(jnp.float32), 1, 128)
    return jax.block_until_ready(w_prep), jax.block_until_ready(b_prep), tk


# ---------------------------------------------------------------------------
# Forward wrapper (jit this; w_prep / b_prep come from prepare_backbone_params)
# ---------------------------------------------------------------------------
def prototypical_networks_forward(support_images, support_labels, query_images,
                                  w_prep, b_prep, *, tk):
    ns = support_images.shape[0]
    nq = query_images.shape[0]
    n_way = support_labels.shape[1]
    f_pad, d_pad = w_prep.shape

    # Pad row counts to the f32 sublane (8) so the support/query split in the
    # epilogue stays tile-aligned.  Padded rows have zero features and zero
    # one-hot labels -> inert; padded query rows are sliced off below.
    ns_pad = 8 * pl.cdiv(ns, 8)
    nq_pad = 8 * pl.cdiv(nq, 8)
    n_total = ns_pad + nq_pad

    # Flatten NCHW -> (N, F), cast straight to bf16 (no intermediate f32 pass),
    # pad rows and the feature dim, and stack support+query: one backbone pass.
    xs = _pad_axis(support_images.reshape(ns, -1).astype(jnp.bfloat16), 0, 8)
    xq = _pad_axis(query_images.reshape(nq, -1).astype(jnp.bfloat16), 0, 8)
    x_all = jnp.concatenate([xs, xq], axis=0)
    x_all = _pad_axis(x_all, 1, tk)
    assert x_all.shape[1] == f_pad, "feature dim mismatch vs prepared W"

    labels_f32 = _pad_axis(support_labels.astype(jnp.float32), 0, 8)

    grid = (f_pad // tk,)
    kernel = functools.partial(_fused_proto_kernel, ns_pad=ns_pad, tk=tk)

    out = pl.pallas_call(
        kernel,
        out_shape=jax.ShapeDtypeStruct((nq_pad, n_way), jnp.float32),
        grid=grid,
        in_specs=[
            # x: fully resident (constant index_map -> single DMA, no per-step
            # descriptors); the K chunk is sliced inside the kernel.
            pl.BlockSpec((n_total, f_pad), lambda k: (0, 0)),
            # W: streamed over K (the only array that needs to pipeline).
            pl.BlockSpec((tk, d_pad), lambda k: (k, 0)),
            pl.BlockSpec((ns_pad, n_way), lambda k: (0, 0)),   # labels (resident)
            pl.BlockSpec((1, d_pad), lambda k: (0, 0)),        # bias (resident)
        ],
        out_specs=pl.BlockSpec((nq_pad, n_way), lambda k: (0, 0)),
        scratch_shapes=[pltpu.VMEM((n_total, d_pad), jnp.float32)],
        compiler_params=pltpu.CompilerParams(
            dimension_semantics=("arbitrary",),    # K is a reduction axis
            vmem_limit_bytes=32 * 1024 * 1024,     # safe on v5e/v6e/v7x at these tiles
        ),
    )(x_all, w_prep, labels_f32, b_prep)

    return out[:nq]


# ---------------------------------------------------------------------------
# Pure-JAX reference (f32 end-to-end) for a numerical check
# ---------------------------------------------------------------------------
def _reference_forward(support_images, support_labels, query_images, w, b):
    ns = support_images.shape[0]
    nq = query_images.shape[0]
    xs = support_images.reshape(ns, -1).astype(jnp.float32)
    xq = query_images.reshape(nq, -1).astype(jnp.float32)
    zs = xs @ w + b
    zq = xq @ w + b
    onehot = support_labels.astype(jnp.float32)
    proto = (onehot.T @ zs) / jnp.sum(onehot, axis=0)[:, None]
    dists = jnp.sqrt(jnp.sum((zq[:, None, :] - proto[None, :, :]) ** 2, axis=-1))
    return jax.nn.softmax(-dists, axis=1)


if __name__ == "__main__":
    key = jax.random.PRNGKey(0)
    k1, k2, k3, k4 = jax.random.split(key, 4)

    n_way, n_shot, n_query_per = 4, 2, 2
    C, H, W_sp = 3, 16, 16
    D = 128
    feat = C * H * W_sp                               # 768 -> single K tile (grid=(1,))

    n_support = n_way * n_shot                        # 8
    n_query = n_way * n_query_per                     # 8

    support_images = jax.random.normal(k1, (n_support, C, H, W_sp), jnp.float32)
    query_images = jax.random.normal(k2, (n_query, C, H, W_sp), jnp.float32)

    support_label_idx = jnp.array([0, 1, 2, 3, 0, 1, 2, 3], dtype=jnp.int32)
    support_labels = jax.nn.one_hot(support_label_idx, n_way, dtype=jnp.float32)

    # deterministic backbone parameters (Flatten + Linear: feat -> D)
    w = jax.random.normal(k3, (feat, D), jnp.float32) / jnp.sqrt(feat)
    b = jax.random.normal(k4, (D,), jnp.float32) * 0.01

    # --- one-time weight preparation (pad + bf16 cast hoisted off hot path) ---
    w_prep, b_prep, tk = prepare_backbone_params(w, b)

    fwd = jax.jit(functools.partial(prototypical_networks_forward, tk=tk))
    out = fwd(support_images, support_labels, query_images, w_prep, b_prep)
    out = jax.block_until_ready(out)

    ref = _reference_forward(support_images, support_labels, query_images, w, b)

    assert out.shape == (n_query, n_way)
    assert bool(jnp.all(jnp.isfinite(out)))
    # Exact softmax denominator -> rows sum to 1 up to float rounding.
    assert bool(jnp.allclose(jnp.sum(out, axis=1), 1.0, atol=1e-4))
    # bf16 MXU feed vs f32 reference -> loose tolerance on the probabilities.
    assert bool(jnp.allclose(out, ref, atol=2e-2))
    print("KERNEL_OK")
</pallas_src>

<mosaic_0001>
module attributes {stable_mosaic.version = 11 : i64} {
  func.func @_fused_proto_kernel(%arg0: i32, %arg1: memref<16x768xbf16, #tpu.memory_space<vmem>>, %arg2: memref<768x128xbf16, #tpu.memory_space<vmem>>, %arg3: memref<8x4xf32, #tpu.memory_space<vmem>>, %arg4: memref<1x128xf32, #tpu.memory_space<vmem>>, %arg5: memref<8x4xf32, #tpu.memory_space<vmem>>, %arg6: memref<16x128xf32, #tpu.memory_space<vmem>>) attributes {dimension_semantics = [#tpu.dimension_semantics<arbitrary>], iteration_bounds = array<i64: 1>, scalar_prefetch = 0 : i64, scratch_operands = 1 : i64, tpu.core_type = #tpu.core_type<tc>, window_params = [{pipeline_mode = #tpu.pipeline_mode<synchronous>, transform_indices = @transform_0, window_bounds = array<i64: 16, 768>}, {transform_indices = @transform_1, window_bounds = array<i64: 768, 128>}, {pipeline_mode = #tpu.pipeline_mode<synchronous>, transform_indices = @transform_2, window_bounds = array<i64: 8, 4>}, {pipeline_mode = #tpu.pipeline_mode<synchronous>, transform_indices = @transform_3, window_bounds = array<i64: 1, 128>}, {pipeline_mode = #tpu.pipeline_mode<synchronous>, transform_indices = @transform_4, window_bounds = array<i64: 8, 4>}]} {
    %c0_i32 = arith.constant 0 : i32
    %0 = arith.cmpi eq, %arg0, %c0_i32 : i32
    %1 = arith.extui %0 : i1 to i32
    %c0_i32_0 = arith.constant 0 : i32
    %2 = arith.cmpi ne, %1, %c0_i32_0 : i32
    scf.if %2 {
      %cst_9 = arith.constant 0.000000e+00 : f32
      %15 = vector.broadcast %cst_9 : f32 to vector<16x128xf32>
      %c0_10 = arith.constant 0 : index
      %c0_11 = arith.constant 0 : index
      %16 = vector.load %arg6[%c0_10, %c0_11] : memref<16x128xf32, #tpu.memory_space<vmem>>, vector<16x128xf32>
      tpu.vector_store %arg6[%c0_10, %c0_11], %15 {strides = array<i32>} : memref<16x128xf32, #tpu.memory_space<vmem>>, vector<16x128xf32>,
    } else {
    }
    %c768_i32 = arith.constant 768 : i32
    %3 = arith.muli %arg0, %c768_i32 : i32
    %4 = tpu.assume_multiple %3, 128 : i32
    %c0 = arith.constant 0 : index
    %5 = arith.index_cast %4 : i32 to index
    %6 = vector.load %arg1[%c0, %5] : memref<16x768xbf16, #tpu.memory_space<vmem>>, vector<16x768xbf16>
    %c0_1 = arith.constant 0 : index
    %c0_2 = arith.constant 0 : index
    %7 = vector.load %arg6[%c0_1, %c0_2] : memref<16x128xf32, #tpu.memory_space<vmem>>, vector<16x128xf32>
    %c0_3 = arith.constant 0 : index
    %c0_4 = arith.constant 0 : index
    %8 = vector.load %arg2[%c0_3, %c0_4] : memref<768x128xbf16, #tpu.memory_space<vmem>>, vector<768x128xbf16>
    %cst = arith.constant dense<0.000000e+00> : vector<16x128xf32>
    %9 = tpu.matmul %6, %8, %cst {dimension_numbers = #tpu.dot_dimension_numbers<[1], [0], [0], [1], [0, 0, 1, 1], [], []>} : vector<16x768xbf16>, vector<768x128xbf16>, vector<16x128xf32> -> vector<16x128xf32>
    %10 = arith.addf %7, %9 : vector<16x128xf32>
    %c0_5 = arith.constant 0 : index
    %c0_6 = arith.constant 0 : index
    %11 = vector.load %arg6[%c0_5, %c0_6] : memref<16x128xf32, #tpu.memory_space<vmem>>, vector<16x128xf32>
    tpu.vector_store %arg6[%c0_5, %c0_6], %10 {strides = array<i32>} : memref<16x128xf32, #tpu.memory_space<vmem>>, vector<16x128xf32>,
    %c0_i32_7 = arith.constant 0 : i32
    %12 = arith.cmpi eq, %arg0, %c0_i32_7 : i32
    %13 = arith.extui %12 : i1 to i32
    %c0_i32_8 = arith.constant 0 : i32
    %14 = arith.cmpi ne, %13, %c0_i32_8 : i32
    scf.if %14 {
      %c0_9 = arith.constant 0 : index
      %c0_10 = arith.constant 0 : index
      %15 = vector.load %arg6[%c0_9, %c0_10] : memref<16x128xf32, #tpu.memory_space<vmem>>, vector<16x128xf32>
      %c0_11 = arith.constant 0 : index
      %c0_12 = arith.constant 0 : index
      %16 = vector.load %arg4[%c0_11, %c0_12] : memref<1x128xf32, #tpu.memory_space<vmem>>, vector<1x128xf32>
      %17 = vector.broadcast %16 : vector<1x128xf32> to vector<16x128xf32>
      %18 = arith.addf %15, %17 : vector<16x128xf32>
      %19 = vector.extract_strided_slice %18 {offsets = [0, 0], sizes = [8, 128], strides = [1, 1]} : vector<16x128xf32> to vector<8x128xf32>
      %20 = vector.extract_strided_slice %18 {offsets = [8, 0], sizes = [8, 128], strides = [1, 1]} : vector<16x128xf32> to vector<8x128xf32>
      %c0_13 = arith.constant 0 : index
      %c0_14 = arith.constant 0 : index
      %21 = vector.load %arg3[%c0_13, %c0_14] : memref<8x4xf32, #tpu.memory_space<vmem>>, vector<8x4xf32>
      %cst_15 = arith.constant dense<0.000000e+00> : vector<4xf32>
      %22 = vector.multi_reduction <add>, %21, %cst_15 [0] : vector<8x4xf32> to vector<4xf32>
      %23 = vector.shape_cast %22 : vector<4xf32> to vector<1x4xf32>
      %cst_16 = arith.constant 1.000000e+00 : f32
      %24 = vector.broadcast %cst_16 : f32 to vector<1x4xf32>
      %25 = arith.maximumf %23, %24 : vector<1x4xf32>
      %cst_17 = arith.constant 1.000000e+00 : f32
      %26 = vector.broadcast %cst_17 : f32 to vector<1x4xf32>
      %27 = arith.divf %26, %25 : vector<1x4xf32>
      %cst_18 = arith.constant dense<0.000000e+00> : vector<128x4xf32>
      %28 = tpu.matmul %19, %21, %cst_18 {dimension_numbers = #tpu.dot_dimension_numbers<[0], [0], [1], [1], [0, 1, 1, 1], [], []>} : vector<8x128xf32>, vector<8x4xf32>, vector<128x4xf32> -> vector<128x4xf32>
      %29 = vector.broadcast %27 : vector<1x4xf32> to vector<128x4xf32>
      %30 = arith.mulf %28, %29 : vector<128x4xf32>
      %cst_19 = arith.constant dense<0.000000e+00> : vector<8x4xf32>
      %31 = tpu.matmul %20, %30, %cst_19 {dimension_numbers = #tpu.dot_dimension_numbers<[1], [0], [0], [1], [0, 0, 1, 1], [], []>} : vector<8x128xf32>, vector<128x4xf32>, vector<8x4xf32> -> vector<8x4xf32>
      %32 = arith.mulf %20, %20 : vector<8x128xf32>
      %cst_20 = arith.constant dense<0.000000e+00> : vector<8xf32>
      %33 = vector.multi_reduction <add>, %32, %cst_20 [1] : vector<8x128xf32> to vector<8xf32>
      %34 = vector.shape_cast %33 : vector<8xf32> to vector<8x1xf32>
      %35 = arith.mulf %30, %30 : vector<128x4xf32>
      %cst_21 = arith.constant dense<0.000000e+00> : vector<4xf32>
      %36 = vector.multi_reduction <add>, %35, %cst_21 [0] : vector<128x4xf32> to vector<4xf32>
      %37 = vector.shape_cast %36 : vector<4xf32> to vector<1x4xf32>
      %38 = vector.broadcast %34 : vector<8x1xf32> to vector<8x4xf32>
      %39 = vector.broadcast %37 : vector<1x4xf32> to vector<8x4xf32>
      %40 = arith.addf %38, %39 : vector<8x4xf32>
      %cst_22 = arith.constant 2.000000e+00 : f32
      %41 = vector.broadcast %cst_22 : f32 to vector<8x4xf32>
      %42 = arith.mulf %41, %31 : vector<8x4xf32>
      %43 = arith.subf %40, %42 : vector<8x4xf32>
      %cst_23 = arith.constant 0.000000e+00 : f32
      %44 = vector.broadcast %cst_23 : f32 to vector<8x4xf32>
      %45 = arith.maximumf %43, %44 : vector<8x4xf32>
      %46 = math.sqrt %45 : vector<8x4xf32>
      %cst_24 = arith.constant 0.000000e+00 : f32
      %47 = vector.broadcast %cst_24 : f32 to vector<8x4xf32>
      %48 = arith.subf %47, %46 : vector<8x4xf32>
      %cst_25 = arith.constant dense<0xFF800000> : vector<8xf32>
      %49 = vector.multi_reduction <maximumf>, %48, %cst_25 [1] : vector<8x4xf32> to vector<8xf32>
      %50 = vector.shape_cast %49 : vector<8xf32> to vector<8x1xf32>
      %51 = vector.broadcast %50 : vector<8x1xf32> to vector<8x4xf32>
      %52 = arith.subf %48, %51 : vector<8x4xf32>
      %53 = math.exp %52 : vector<8x4xf32>
      %cst_26 = arith.constant dense<0.000000e+00> : vector<8xf32>
      %54 = vector.multi_reduction <add>, %53, %cst_26 [1] : vector<8x4xf32> to vector<8xf32>
      %55 = vector.shape_cast %54 : vector<8xf32> to vector<8x1xf32>
      %56 = vector.broadcast %55 : vector<8x1xf32> to vector<8x4xf32>
      %57 = arith.divf %53, %56 : vector<8x4xf32>
      %c0_27 = arith.constant 0 : index
      %c0_28 = arith.constant 0 : index
      %58 = vector.load %arg5[%c0_27, %c0_28] : memref<8x4xf32, #tpu.memory_space<vmem>>, vector<8x4xf32>
      tpu.vector_store %arg5[%c0_27, %c0_28], %57 {strides = array<i32>} : memref<8x4xf32, #tpu.memory_space<vmem>>, vector<8x4xf32>,
    } else {
    }
    return
  }
  func.func @transform_0(%arg0: i32) -> (i32, i32) {
    %c0_i32 = arith.constant 0 : i32
    %c0_i32_0 = arith.constant 0 : i32
    %c0_i32_1 = arith.constant 0 : i32
    return %c0_i32, %c0_i32_0 : i32, i32
  }
  func.func @transform_1(%arg0: i32) -> (i32, i32) {
    %c0_i32 = arith.constant 0 : i32
    %c0_i32_0 = arith.constant 0 : i32
    return %arg0, %c0_i32 : i32, i32
  }
  func.func @transform_2(%arg0: i32) -> (i32, i32) {
    %c0_i32 = arith.constant 0 : i32
    %c0_i32_0 = arith.constant 0 : i32
    %c0_i32_1 = arith.constant 0 : i32
    return %c0_i32, %c0_i32_0 : i32, i32
  }
  func.func @transform_3(%arg0: i32) -> (i32, i32) {
    %c0_i32 = arith.constant 0 : i32
    %c0_i32_0 = arith.constant 0 : i32
    %c0_i32_1 = arith.constant 0 : i32
    return %c0_i32, %c0_i32_0 : i32, i32
  }
  func.func @transform_4(%arg0: i32) -> (i32, i32) {
    %c0_i32 = arith.constant 0 : i32
    %c0_i32_0 = arith.constant 0 : i32
    %c0_i32_1 = arith.constant 0 : i32
    return %c0_i32, %c0_i32_0 : i32, i32
  }
}

</mosaic_0001>

<bundles_post_ra>
// kernel: prototypical_networks_forward.1
= control target key start
LH: loop header
LB: loop body
LE: loop exit
PB: predicated region body
PF: predicated region fallthrough
CT: control target
= control target key end

     0   :  { %vm636_vm0 = vcmask 64512   ;;  %vm1327_vm1 = vmmov 0   ;;  %vm593_vm2 = vcmask 31744   ;;  %s1592_s1 = inlined_call_operand.vmem [shape: bf16[768,128], index: 1, kind: input, shape index: {}]   ;;  %s1593_s0 = inlined_call_operand.vmem [shape: bf16[16,768], index: 0, kind: input, shape index: {}]   ;;  %s1594_s3 = inlined_call_operand.vmem [shape: f32[1,128], index: 3, kind: input, shape index: {}]   ;;  %s1595_s2 = inlined_call_operand.vmem [shape: f32[8,4], index: 2, kind: input, shape index: {}]   ;;  %s1596_s4 = inlined_call_operand.vmem [shape: f32[8,4], index: 4, kind: output, shape index: {}]  }
   0x1   :  { %v1261_v0 = vld [vmem:[%s1592_s1 + $0x40] sm:$0xff]   ;;  %v1265_v4 = vld [vmem:[%s1592_s1 + $0x48] sm:$0xff]   ;;  %v1269_v8 = vld [vmem:[%s1592_s1 + $0x50] sm:$0xff]  }
   0x2   :  { %v1262_v1 = vld [vmem:[%s1592_s1 + $0xc0] sm:$0xff]   ;;  %1073 = vmatprep.subr.bf16.mxu0 %v1261_v0  ;;  %v1266_v5 = vld [vmem:[%s1592_s1 + $0xc8] sm:$0xff]   ;;  %v1270_v9 = vld [vmem:[%s1592_s1 + $0xd0] sm:$0xff]  }
   0x3   :  { %v1263_v2 = vld [vmem:[%s1592_s1] sm:$0xff]   ;;  %1095 = vmatprep.subr.bf16.mxu1 %v1262_v1  ;;  %v1267_v6 = vld [vmem:[%s1592_s1 + $0x8] sm:$0xff]   ;;  %v1271_v10 = vld [vmem:[%s1592_s1 + $0x10] sm:$0xff]  }
   0x4   :  { %v1264_v3 = vld [vmem:[%s1592_s1 + $0x80] sm:$0xff]   ;;  %1074 = vmatpush3.bf16.msra.mxu0 %v1263_v2  ;;  %v1268_v7 = vld [vmem:[%s1592_s1 + $0x88] sm:$0xff]   ;;  %v1272_v11 = vld [vmem:[%s1592_s1 + $0x90] sm:$0xff]  }
   0x5   :  { %1096 = vmatpush3.bf16.msra.mxu1 %v1264_v3  ;;  %1075 = vmatprep.subr.bf16.mxu0 %v1265_v4  ;;  %v1273_v12 = vld [vmem:[%s1592_s1 + $0x58] sm:$0xff]   ;;  %v1277_v16 = vld [vmem:[%s1592_s1 + $0x60] sm:$0xff]   ;;  %v1281_v20 = vld [vmem:[%s1592_s1 + $0x68] sm:$0xff]  }
   0x6   :  { %1097 = vmatprep.subr.bf16.mxu1 %v1266_v5  ;;  %v1274_v13 = vld [vmem:[%s1592_s1 + $0xd8] sm:$0xff]   ;;  %v1278_v17 = vld [vmem:[%s1592_s1 + $0xe0] sm:$0xff]   ;;  %v1282_v21 = vld [vmem:[%s1592_s1 + $0xe8] sm:$0xff]  }
   0x7   :  { %v1275_v14 = vld [vmem:[%s1592_s1 + $0x18] sm:$0xff]   ;;  %v1279_v18 = vld [vmem:[%s1592_s1 + $0x20] sm:$0xff]   ;;  %v1283_v22 = vld [vmem:[%s1592_s1 + $0x28] sm:$0xff]  }
   0x8   :  { %1076 = vmatpush3.bf16.msra.mxu0 %v1267_v6  ;;  %v1276_v15 = vld [vmem:[%s1592_s1 + $0x98] sm:$0xff]   ;;  %v1280_v19 = vld [vmem:[%s1592_s1 + $0xa0] sm:$0xff]   ;;  %v1284_v23 = vld [vmem:[%s1592_s1 + $0xa8] sm:$0xff]  }
   0x9   :  { %1098 = vmatpush3.bf16.msra.mxu1 %v1268_v7  ;;  %1077 = vmatprep.subr.bf16.mxu0 %v1269_v8  ;;  %v1285_v24 = vld [vmem:[%s1592_s1 + $0x70] sm:$0xff]   ;;  %v1289_v28 = vld [vmem:[%s1592_s1 + $0x78] sm:$0xff]   ;;  %v1296_v34 = vld [vmem:[%s1593_s0 + $0x8] ss:$24 sps:$4 sm:$0xff]  }
   0xa   :  { %1099 = vmatprep.subr.bf16.mxu1 %v1270_v9  ;;  %v1286_v25 = vld [vmem:[%s1592_s1 + $0xf0] sm:$0xff]   ;;  %v1290_v29 = vld [vmem:[%s1592_s1 + $0xf8] sm:$0xff]   ;;  %v1298_v35 = vld [vmem:[%s1593_s0 + $0xc] ss:$24 sps:$4 sm:$0xff]  }
   0xb   :  { %v1287_v26 = vld [vmem:[%s1592_s1 + $0x30] sm:$0xff]   ;;  %v1291_v30 = vld [vmem:[%s1592_s1 + $0x38] sm:$0xff]   ;;  %v1299_v36 = vld [vmem:[%s1592_s1 + $0x140] sm:$0xff]   ;;  %524 = vmatprep.mubr.bf16.mxu1 %v1298_v35 }
   0xc   :  { %1078 = vmatpush3.bf16.msra.mxu0 %v1271_v10  ;;  %v1288_v27 = vld [vmem:[%s1592_s1 + $0xb0] sm:$0xff]   ;;  %v1292_v31 = vld [vmem:[%s1592_s1 + $0xb8] sm:$0xff]   ;;  %v1300_v37 = vld [vmem:[%s1592_s1 + $0x100] sm:$0xff]  }
   0xd   :  { %1100 = vmatpush3.bf16.msra.mxu1 %v1272_v11  ;;  %1079 = vmatprep.subr.bf16.mxu0 %v1273_v12  ;;  %v1293_v32 = vld [vmem:[%s1593_s0] ss:$24 sps:$4 sm:$0xff]   ;;  %v1295_v33 = vld [vmem:[%s1593_s0 + $0x4] ss:$24 sps:$4 sm:$0xff]   ;;  %v1301_v38 = vld [vmem:[%s1592_s1 + $0x148] sm:$0xff]  }
   0xe   :  { %1101 = vmatprep.subr.bf16.mxu1 %v1274_v13  ;;  %483 = vmatprep.mubr.bf16.mxu0 %v1295_v33  ;;  %v1302_v39 = vld [vmem:[%s1592_s1 + $0x108] sm:$0xff]   ;;  %v1303_v40 = vld [vmem:[%s1592_s1 + $0x150] sm:$0xff]   ;;  %v1305_v42 = vld [vmem:[%s1592_s1 + $0x158] sm:$0xff]   ;;  %v1326_v33 = vmov 0.0|0.0  }
   0xf   :  { %v1304_v41 = vld [vmem:[%s1592_s1 + $0x110] sm:$0xff]   ;;  %v1306_v43 = vld [vmem:[%s1592_s1 + $0x118] sm:$0xff]   ;;  %v1307_v44 = vld [vmem:[%s1592_s1 + $0x160] sm:$0xff]  }
  0x10   :  { %1080 = vmatpush3.bf16.msra.mxu0 %v1275_v14  ;;  %v1308_v45 = vld [vmem:[%s1592_s1 + $0x120] sm:$0xff]   ;;  %v1309_v46 = vld [vmem:[%s1592_s1 + $0x168] sm:$0xff]   ;;  %v1311_v49 = vld [vmem:[%s1592_s1 + $0x170] sm:$0xff]  }
  0x11   :  { %1102 = vmatpush3.bf16.msra.mxu1 %v1276_v15  ;;  %1081 = vmatprep.subr.bf16.mxu0 %v1277_v16  ;;  %v1317_v47 = vld [vmem:[%s1593_s0 + $0x14] ss:$24 sps:$4 sm:$0xff]   ;;  %v1313_v51 = vld [vmem:[%s1592_s1 + $0x178] sm:$0xff]   ;;  %v1315_v53 = vld [vmem:[%s1593_s0 + $0x10] ss:$24 sps:$4 sm:$0xff]  }
  0x12   :  { %1103 = vmatprep.subr.bf16.mxu1 %v1278_v17  ;;  %v1310_v48 = vld [vmem:[%s1592_s1 + $0x128] sm:$0xff]   ;;  %v1312_v50 = vld [vmem:[%s1592_s1 + $0x130] sm:$0xff]   ;;  %v1314_v52 = vld [vmem:[%s1592_s1 + $0x138] sm:$0xff]  }
  0x13   :  { %v1056_v9 = vld [vmem:[%s1594_s3] ss:$0 sm:$0xff] }
  0x14   :  { %1082 = vmatpush3.bf16.msra.mxu0 %v1279_v18  ;;  %v592_v15 = vld [vmem:[%s1595_s2] sm:$0xff] }
  0x15   :  { %1104 = vmatpush3.bf16.msra.mxu1 %v1280_v19  ;;  %1083 = vmatprep.subr.bf16.mxu0 %v1281_v20  ;;  %v594_v35 = vsel %vm593_vm2, %v592_v15, 0.0 }
  0x16   :  { %1105 = vmatprep.subr.bf16.mxu1 %v1282_v21 }
  0x18   :  { %1084 = vmatpush3.bf16.msra.mxu0 %v1283_v22 }
  0x19   :  { %1106 = vmatpush3.bf16.msra.mxu1 %v1284_v23  ;;  %1085 = vmatprep.subr.bf16.mxu0 %v1285_v24 }
  0x1a   :  { %1107 = vmatprep.subr.bf16.mxu1 %v1286_v25 }
  0x1c   :  { %1086 = vmatpush3.bf16.msra.mxu0 %v1287_v26 }
  0x1d   :  { %1108 = vmatpush3.bf16.msra.mxu1 %v1288_v27  ;;  %1087 = vmatprep.subr.bf16.mxu0 %v1289_v28 }
  0x1e   :  { %1109 = vmatprep.subr.bf16.mxu1 %v1290_v29 }
  0x20   :  { %1088 = vmatpush3.bf16.msra.mxu0 %v1291_v30 }
  0x21   :  { %1110 = vmatpush3.bf16.msra.mxu1 %v1292_v31  ;;  %1117 = vmatprep.subr.bf16.mxu0 %v1299_v36  ;;  %v595_v36 = vrot.slane %v594_v35, 4 }
  0x22   :  { %1173 = vmatprep.subr.mxu1 %v592_v15 }
  0x23   :  { %484 = vmatmul.mubr.bf16.vlgmr.msra.gmra.mrb[0].mxu0 %v1293_v32 }
  0x24   :  { %525 = vmatmul.mubr.bf16.vlgmr.msra.gmra.mrb[0].mxu1 %v1296_v34  ;;  %1118 = vmatpush3.bf16.msra.mxu0 %v1300_v37  ;;  %v1328_v34 = vmov 0.0   ;;  %v596_v37 = vadd.f32 %v595_v36, %v594_v35 }
  0x25   :  { %1119 = vmatprep.subr.bf16.mxu0 %v1301_v38  ;;  %565 = vmatprep.mubr.bf16.mxu0 %v1317_v47 }
  0x26   :  { %1174 = vmatpush3.msra.mxu1 %v592_v15  ;;  %v597_v38 = vrot.slane %v596_v37, 2 }
  0x27   :  { %1234 = vmatprep.subr.bf16.mxu1 %v1326_v33 }
  0x28   :  { %1120 = vmatpush3.bf16.msra.mxu0 %v1302_v39  ;;  %v598_v39 = vadd.f32 %v597_v38, %v596_v37 }
  0x29   :  { %1121 = vmatprep.subr.bf16.mxu0 %v1303_v40 }
  0x2a   :  { %v599_v40 = vrot.slane %v598_v39, 1 }
  0x2c   :  { %1122 = vmatpush3.bf16.msra.mxu0 %v1304_v41  ;;  %v600_v41 = vadd.f32 %v599_v40, %v598_v39 }
  0x2d   :  { %1123 = vmatprep.subr.bf16.mxu0 %v1305_v42 }
  0x2e   :  { %v601_v42 = vmax.f32 %v600_v41, 1.0 }
  0x30   :  { %1124 = vmatpush3.bf16.msra.mxu0 %v1306_v43  ;;  %1318 = vrcp.f32 %v601_v42 }
  0x31   :  { %1125 = vmatprep.subr.bf16.mxu0 %v1307_v44 }
  0x34   :  { %1126 = vmatpush3.bf16.msra.mxu0 %v1308_v45 }
  0x35   :  { %1127 = vmatprep.subr.bf16.mxu0 %v1309_v46 }
  0x38   :  { %1128 = vmatpush3.bf16.msra.mxu0 %v1310_v48 }
  0x39   :  { %1129 = vmatprep.subr.bf16.mxu0 %v1311_v49 }
  0x3a   :  { %v1544_v43 = vpop.eup %1318 }
  0x3c   :  { %1130 = vmatpush3.bf16.msra.mxu0 %v1312_v50 }
  0x3d   :  { %1131 = vmatprep.subr.bf16.mxu0 %v1313_v51 }
  0x40   :  { %1132 = vmatpush3.bf16.msra.mxu0 %v1314_v52 }
  0x43   :  { %566 = vmatmul.mubr.bf16.vlgmr.msra.gmra.mrb[4].mxu0 %v1315_v53 }
  0xf6   :  { %v1089_v54 = vpop.f32.mrb[0].mxu0 }
  0xf7   :  { %v1111_v55 = vpop.f32.mrb[0].mxu1  ;;  %v1090_v56 = vpop.f32.mrb[1].mxu0 }
  0xf8   :  { %v1091_v57 = vadd.f32 %v1090_v56, %v1089_v54  ;;  %v1112_v58 = vpop.f32.mrb[1].mxu1  ;;  %v1092_v59 = vpop.f32.mrb[2].mxu0 }
  0xf9   :  { %v1113_v60 = vadd.f32 %v1112_v58, %v1111_v55  ;;  %v1114_v61 = vpop.f32.mrb[2].mxu1  ;;  %v1093_v62 = vpop.f32.mrb[3].mxu0 }
  0xfa   :  { %v1094_v63 = vadd.f32 %v1093_v62, %v1092_v59  ;;  %v1115_v0 = vpop.f32.mrb[3].mxu1 }
  0xfb   :  { %v527_v1 = vadd.f32 %v1113_v60, %v1091_v57  ;;  %v1116_v2 = vadd.f32 %v1115_v0, %v1114_v61 }
  0xfd   :  { %v530_v3 = vadd.f32 %v1116_v2, %v1094_v63 }
 0x116   :  { %v1133_v4 = vpop.f32.mrb[4].mxu0 }
 0x117   :  { %v1134_v5 = vpop.f32.mrb[5].mxu0 }
 0x118   :  { %v1135_v6 = vadd.f32 %v1134_v5, %v1133_v4  ;;  %v1136_v7 = vpop.f32.mrb[6].mxu0 }
 0x119   :  { %v1137_v8 = vpop.f32.mrb[7].mxu0 }
 0x11a   :  { %v1138_v10 = vadd.f32 %v1137_v8, %v1136_v7  ;;  %v568_v11 = vadd.f32 %v1135_v6, %v527_v1 }
 0x11c   :  { %v571_v12 = vadd.f32 %v1138_v10, %v530_v3  ;;  %v590_v13 = vadd.f32 %v1056_v9, %v568_v11 }
 0x11e   :  { %v1519_v14 = vadd.f32 %v1056_v9, %v571_v12  ;;  %604 = vxpose.xlu0.b32.start.end [1/1] (short) %v590_v13, 128 }
 0x120   :  { %v916_v16 = vmul.f32 %v1519_v14, %v1519_v14 }
 0x187   :  { %917 = vadd.xlane.f32.xlu0 %v916_v16 }
 0x19e   :  { %v620_v17 = vpop.trf.xlu0 }
 0x19f   :  { %1175 = vmatprep.mubr.msk.f32.mxu1 %vm636_vm0, %v620_v17 }
 0x1a2   :  { %v621_v18 = vpop.trf.xlu0 }
 0x1a3   :  { %1176 = vmatmul.mubr.msk.f32.vlgmr.msra.gmra.mrb[4].mxu1 %vm636_vm0, %v621_v18 }
 0x1a6   :  { %v622_v19 = vpop.trf.xlu0 }
 0x1a7   :  { %1178 = vmatprep.mubr.msk.f32.mxu1 %vm636_vm0, %v622_v19 }
 0x1aa   :  { %v623_v20 = vpop.trf.xlu0 }
 0x1ab   :  { %1179 = vmatmul.mubr.msk.f32.gmra.mrb[6].mxu1 %vm636_vm0, %v623_v20 }
 0x1ae   :  { %v624_v21 = vpop.trf.xlu0 }
 0x1af   :  { %1181 = vmatprep.mubr.msk.f32.mxu1 %vm636_vm0, %v624_v21 }
 0x1b2   :  { %v625_v22 = vpop.trf.xlu0 }
 0x1b3   :  { %1182 = vmatmul.mubr.msk.f32.gmra.mrb[8].mxu1 %vm636_vm0, %v625_v22 }
 0x1b6   :  { %v626_v23 = vpop.trf.xlu0 }
 0x1b7   :  { %1184 = vmatprep.mubr.msk.f32.mxu1 %vm636_vm0, %v626_v23 }
 0x1ba   :  { %v627_v24 = vpop.trf.xlu0 }
 0x1bb   :  { %1185 = vmatmul.mubr.msk.f32.gmra.mrb[10].mxu1 %vm636_vm0, %v627_v24 }
 0x1be   :  { %v628_v25 = vpop.trf.xlu0 }
 0x1bf   :  { %1187 = vmatprep.mubr.msk.f32.mxu1 %vm636_vm0, %v628_v25 }
 0x1c2   :  { %v629_v26 = vpop.trf.xlu0 }
 0x1c3   :  { %1188 = vmatmul.mubr.msk.f32.gmra.mrb[12].mxu1 %vm636_vm0, %v629_v26 }
 0x1c6   :  { %v630_v27 = vpop.trf.xlu0 }
 0x1c7   :  { %1190 = vmatprep.mubr.msk.f32.mxu1 %vm636_vm0, %v630_v27 }
 0x1ca   :  { %v631_v28 = vpop.trf.xlu0 }
 0x1cb   :  { %1191 = vmatmul.mubr.msk.f32.gmra.mrb[14].mxu1 %vm636_vm0, %v631_v28 }
 0x1ce   :  { %v632_v29 = vpop.trf.xlu0 }
 0x1cf   :  { %1193 = vmatprep.mubr.msk.f32.mxu1 %vm636_vm0, %v632_v29 }
 0x1d2   :  { %v633_v30 = vpop.trf.xlu0 }
 0x1d3   :  { %1194 = vmatmul.mubr.msk.f32.gmra.mrb[16].mxu1 %vm636_vm0, %v633_v30 }
 0x1d6   :  { %v634_v31 = vpop.trf.xlu0 }
 0x1d7   :  { %1196 = vmatprep.mubr.msk.f32.mxu1 %vm636_vm0, %v634_v31 }
 0x1da   :  { %v635_v32 = vpop.trf.xlu0 }
 0x1db   :  { %1197 = vmatmul.mubr.msk.f32.gmra.mrb[18].mxu1 %vm636_vm0, %v635_v32 }
 0x1dc   :  { %1231 = vmatprep.mubr.msk.f32.mxu1 %vm1327_vm1, %v1328_v34 }
 0x276   :  { %v1177_v44 = vpop.f32.mrb[4].mxu1 }
 0x277   :  { %v831_v45 = vmul.f32 %v1544_v43, %v1177_v44  ;;  %v751_v46 = vpop.f32.mrb[5].mxu1 }
 0x278   :  { %v830_v47 = vmul.f32 %v1544_v43, %v751_v46 }
 0x279   :  { %v920_v48 = vmul.f32 %v831_v45, %v831_v45 }
 0x27a   :  { %v1235_v49 = vpack.c.bf16 %v831_v45, %v830_v47  ;;  %v919_v50 = vmul.f32 %v830_v47, %v830_v47 }
 0x27b   :  { %v936_v51 = vsel %vm593_vm2, %v920_v48, 0.0 }
 0x27c   :  { %v935_v52 = vsel %vm593_vm2, %v919_v50, 0.0  ;;  %1236 = vmatpush3.bf16.msra.mxu1 %v1235_v49 }
 0x27d   :  { %v937_v53 = vadd.f32 %v936_v51, %v935_v52  ;;  %1237 = vmatprep.subr.bf16.mxu1 %v1326_v33 }
 0x27e   :  { %v1180_v54 = vpop.f32.mrb[6].mxu1 }
 0x27f   :  { %v833_v55 = vmul.f32 %v1544_v43, %v1180_v54  ;;  %v761_v56 = vpop.f32.mrb[7].mxu1 }
 0x280   :  { %v832_v57 = vmul.f32 %v1544_v43, %v761_v56 }
 0x281   :  { %v922_v58 = vmul.f32 %v833_v55, %v833_v55 }
 0x282   :  { %v1238_v59 = vpack.c.bf16 %v833_v55, %v832_v57  ;;  %v921_v60 = vmul.f32 %v832_v57, %v832_v57 }
 0x283   :  { %v940_v63 = vsel %vm593_vm2, %v922_v58, 0.0 }
 0x284   :  { %v938_v61 = vsel %vm593_vm2, %v921_v60, 0.0  ;;  %1239 = vmatpush3.bf16.msra.mxu1 %v1238_v59 }
 0x285   :  { %v939_v62 = vadd.f32 %v938_v61, %v937_v53  ;;  %1240 = vmatprep.subr.bf16.mxu1 %v1326_v33 }
 0x286   :  { %v1183_v0 = vpop.f32.mrb[8].mxu1 }
 0x287   :  { %v835_v1 = vmul.f32 %v1544_v43, %v1183_v0  ;;  %v771_v2 = vpop.f32.mrb[9].mxu1  ;;  %v941_v3 = vadd.f32 %v940_v63, %v939_v62 }
 0x288   :  { %v834_v4 = vmul.f32 %v1544_v43, %v771_v2 }
 0x289   :  { %v924_v5 = vmul.f32 %v835_v1, %v835_v1 }
 0x28a   :  { %v1241_v6 = vpack.c.bf16 %v835_v1, %v834_v4  ;;  %v923_v7 = vmul.f32 %v834_v4, %v834_v4 }
 0x28b   :  { %v944_v10 = vsel %vm593_vm2, %v924_v5, 0.0 }
 0x28c   :  { %v942_v8 = vsel %vm593_vm2, %v923_v7, 0.0  ;;  %1242 = vmatpush3.bf16.msra.mxu1 %v1241_v6 }
 0x28d   :  { %v943_v9 = vadd.f32 %v942_v8, %v941_v3  ;;  %1243 = vmatprep.subr.bf16.mxu1 %v1326_v33 }
 0x28e   :  { %v1186_v11 = vpop.f32.mrb[10].mxu1 }
 0x28f   :  { %v837_v12 = vmul.f32 %v1544_v43, %v1186_v11  ;;  %v781_v13 = vpop.f32.mrb[11].mxu1  ;;  %v945_v15 = vadd.f32 %v944_v10, %v943_v9  ;;  %v918_v11 = vpop.xlane.xlu0 %917 }
 0x290   :  { %v836_v16 = vmul.f32 %v1544_v43, %v781_v13 }
 0x291   :  { %v926_v17 = vmul.f32 %v837_v12, %v837_v12 }
 0x292   :  { %v1244_v18 = vpack.c.bf16 %v837_v12, %v836_v16  ;;  %v925_v19 = vmul.f32 %v836_v16, %v836_v16 }
 0x293   :  { %v948_v22 = vsel %vm593_vm2, %v926_v17, 0.0 }
 0x294   :  { %v946_v20 = vsel %vm593_vm2, %v925_v19, 0.0  ;;  %1245 = vmatpush3.bf16.msra.mxu1 %v1244_v18 }
 0x295   :  { %v947_v21 = vadd.f32 %v946_v20, %v945_v15  ;;  %1246 = vmatprep.subr.bf16.mxu1 %v1326_v33 }
 0x296   :  { %v1189_v23 = vpop.f32.mrb[12].mxu1 }
 0x297   :  { %v839_v24 = vmul.f32 %v1544_v43, %v1189_v23  ;;  %v791_v25 = vpop.f32.mrb[13].mxu1  ;;  %v949_v26 = vadd.f32 %v948_v22, %v947_v21 }
 0x298   :  { %v838_v27 = vmul.f32 %v1544_v43, %v791_v25 }
 0x299   :  { %v928_v28 = vmul.f32 %v839_v24, %v839_v24 }
 0x29a   :  { %v1247_v29 = vpack.c.bf16 %v839_v24, %v838_v27  ;;  %v927_v30 = vmul.f32 %v838_v27, %v838_v27 }
 0x29b   :  { %v952_v34 = vsel %vm593_vm2, %v928_v28, 0.0 }
 0x29c   :  { %v950_v31 = vsel %vm593_vm2, %v927_v30, 0.0  ;;  %1248 = vmatpush3.bf16.msra.mxu1 %v1247_v29 }
 0x29d   :  { %v951_v32 = vadd.f32 %v950_v31, %v949_v26  ;;  %1249 = vmatprep.subr.bf16.mxu1 %v1326_v33 }
 0x29e   :  { %v1192_v35 = vpop.f32.mrb[14].mxu1 }
 0x29f   :  { %v841_v36 = vmul.f32 %v1544_v43, %v1192_v35  ;;  %v801_v37 = vpop.f32.mrb[15].mxu1  ;;  %v953_v38 = vadd.f32 %v952_v34, %v951_v32 }
 0x2a0   :  { %v840_v39 = vmul.f32 %v1544_v43, %v801_v37 }
 0x2a1   :  { %v930_v40 = vmul.f32 %v841_v36, %v841_v36 }
 0x2a2   :  { %v1250_v41 = vpack.c.bf16 %v841_v36, %v840_v39  ;;  %v929_v42 = vmul.f32 %v840_v39, %v840_v39 }
 0x2a3   :  { %v956_v46 = vsel %vm593_vm2, %v930_v40, 0.0 }
 0x2a4   :  { %v954_v44 = vsel %vm593_vm2, %v929_v42, 0.0  ;;  %1251 = vmatpush3.bf16.msra.mxu1 %v1250_v41 }
 0x2a5   :  { %v955_v45 = vadd.f32 %v954_v44, %v953_v38  ;;  %1252 = vmatprep.subr.bf16.mxu1 %v1326_v33 }
 0x2a6   :  { %v1195_v47 = vpop.f32.mrb[16].mxu1 }
 0x2a7   :  { %v843_v48 = vmul.f32 %v1544_v43, %v1195_v47  ;;  %v811_v49 = vpop.f32.mrb[17].mxu1  ;;  %v957_v50 = vadd.f32 %v956_v46, %v955_v45 }
 0x2a8   :  { %v842_v51 = vmul.f32 %v1544_v43, %v811_v49 }
 0x2a9   :  { %v932_v52 = vmul.f32 %v843_v48, %v843_v48 }
 0x2aa   :  { %v1253_v53 = vpack.c.bf16 %v843_v48, %v842_v51  ;;  %v931_v54 = vmul.f32 %v842_v51, %v842_v51 }
 0x2ab   :  { %v960_v57 = vsel %vm593_vm2, %v932_v52, 0.0 }
 0x2ac   :  { %v958_v55 = vsel %vm593_vm2, %v931_v54, 0.0  ;;  %1254 = vmatpush3.bf16.msra.mxu1 %v1253_v53 }
 0x2ad   :  { %v959_v56 = vadd.f32 %v958_v55, %v957_v50  ;;  %1255 = vmatprep.subr.bf16.mxu1 %v1326_v33 }
 0x2ae   :  { %v1198_v58 = vpop.f32.mrb[18].mxu1 }
 0x2af   :  { %v845_v59 = vmul.f32 %v1544_v43, %v1198_v58  ;;  %v821_v60 = vpop.f32.mrb[19].mxu1  ;;  %v961_v61 = vadd.f32 %v960_v57, %v959_v56 }
 0x2b0   :  { %v844_v62 = vmul.f32 %v1544_v43, %v821_v60 }
 0x2b1   :  { %v934_v63 = vmul.f32 %v845_v59, %v845_v59 }
 0x2b2   :  { %v1256_v0 = vpack.c.bf16 %v845_v59, %v844_v62  ;;  %v933_v1 = vmul.f32 %v844_v62, %v844_v62 }
 0x2b3   :  { %v964_v4 = vsel %vm593_vm2, %v934_v63, 0.0 }
 0x2b4   :  { %v962_v2 = vsel %vm593_vm2, %v933_v1, 0.0  ;;  %1257 = vmatpush3.bf16.msra.mxu1 %v1256_v0 }
 0x2b5   :  { %v963_v3 = vadd.f32 %v962_v2, %v961_v61 }
 0x2b7   :  { %v965_v5 = vadd.f32 %v964_v4, %v963_v3  ;;  %1232 = vmatmul.mubr.f32.vlgmr.msra.gmra.mrb[20].mxu1 %v1519_v14 }
 0x2b9   :  { %v966_v33 = vrot.slane %v965_v5, 4 }
 0x2bb   :  { %v967_v6 = vadd.f32 %v966_v33, %v965_v5 }
 0x2bd   :  { %v968_v7 = vrot.slane %v967_v6, 2 }
 0x2bf   :  { %v969_v8 = vadd.f32 %v968_v7, %v967_v6 }
 0x2c1   :  { %v970_v9 = vrot.slane %v969_v8, 1 }
 0x2c3   :  { %v971_v10 = vadd.f32 %v970_v9, %v969_v8 }
 0x2c5   :  { %v972_v12 = vadd.f32 %v971_v10, %v918_v11 }
 0x38a   :  { %v912_v43 = vpop.f32.mrb[20].mxu1 }
 0x38b   :  { %v973_v13 = vmul.f32 2.0, %v912_v43  ;;  %v1233_v15 = vpop.f32.mrb[21].mxu1 }
 0x38d   :  { %v974_v16 = vsub.f32 %v972_v12, %v973_v13 }
 0x38f   :  { %v975_v17 = vmax.f32 %v974_v16, 0.0 }
 0x391   :  { %1320 = vrsqrt.f32 %v975_v17  ;;  %vm978_vm3 = vcmp.eq.f32.partialorder %v975_v17, inf  ;;  %v981_v20 = vand.u32 2147483648, %v975_v17  ;;  %vm980_vm4 = vcmp.eq.f32.partialorder %v975_v17, 0.0 }
 0x39b   :  { %v1321_v18 = vpop.eup %1320 }
 0x39c   :  { %v977_v19 = vmul.f32 %v1321_v18, %v975_v17 }
 0x39e   :  { %v979_v21 = vsel %vm978_vm3, %v975_v17, %v977_v19 }
 0x39f   :  { %v982_v14 = vsel %vm980_vm4, %v981_v20, %v979_v21 }
 0x3a0   :  { %v983_v22 = vsub.f32 0.0, %v982_v14 }
 0x3a2   :  { %v984_v23 = vsel %vm593_vm2, %v983_v22, -inf }
 0x3a3   :  { %985 = vmax.xlane.f32.xlu1 %v984_v23 }
 0x430   :  { %v986_v24 = vpop.xlane.xlu1 %985 }
 0x431   :  { %v987_v25 = vsub.f32 %v983_v22, %v986_v24 }
 0x433   :  { %v988_v26 = vmul.f32 1.442695, %v987_v25 }
 0x435   :  { %1322 = vpow2.f32 %v988_v26 }
 0x43f   :  { %v1323_v27 = vpop.eup %1322 }
 0x440   :  { %v990_v28 = vsel %vm593_vm2, %v1323_v27, 0.0 }
 0x441   :  { %991 = vadd.xlane.f32.xlu1 %v990_v28 }
 0x4ce   :  { %v992_v29 = vpop.xlane.xlu1 %991 }
 0x4cf   :  { %1324 = vrcp.f32 %v992_v29 }
 0x4d9   :  { %v1325_v30 = vpop.eup %1324 }
 0x4da   :  { %v994_v31 = vmul.f32 %v1325_v30, %v1323_v27 }
 0x4dc   :  { %995 = vst.msk [vmem:[%s1596_s4] sm:$0xff] %vm593_vm2, %v994_v31 }

</bundles_post_ra>
